<compile_context>
chip_gen: v6e
topology: v6e:2x2x1
jax: 0.10.0
libtpu: 0.0.40
codegen_flags: <defaults>
</compile_context>

<pallas_src>
import functools

import jax
import jax.numpy as jnp
from jax.experimental import pallas as pl
from jax.experimental.pallas import tpu as pltpu


def _conv1d_deriv_kernel(w_ref, x_ref, o_ref, *, kernel_size):
    # w_ref: SMEM (K,)        filter taps, pre-scaled by 1/deno
    # x_ref: VMEM (TN, L_BLK) row tile of input (edge blocks partially garbage)
    # o_ref: VMEM (TN, L_BLK) output tile; columns >= L_out / rows >= N are
    #                          out-of-bounds of out_shape and masked on store.
    x = x_ref[...]
    l_blk = x.shape[-1]
    acc = w_ref[0] * x                               # tap 0: no shift
    for k in range(1, kernel_size):                  # K is tiny & static: unrolled
        # y[:, i] = x[:, (i + k) % l_blk]  — left shift by k lanes on the XLU.
        # Wrap-around / garbage lanes only land in columns >= L_out, which are
        # out-of-bounds of the declared output and masked on store.
        acc = acc + w_ref[k] * pltpu.roll(x, shift=l_blk - k, axis=1)
    o_ref[...] = acc


def conv1d_derivative(x, der_filter, deno):
    """Equivalent of Conv1dDerivative.forward.

    x:          (N, 1, L)  float32  (PyTorch NCL)
    der_filter: (1, 1, K)  float32  (PyTorch conv1d weight, bias=False)
    deno:       python scalar
    returns     (N, 1, L - K + 1) float32
    """
    x = jnp.asarray(x, jnp.float32)
    n, c, l = x.shape
    assert c == 1, "Conv1dDerivative uses a single input channel"

    # Fold 1/deno into the (non-trainable) taps: removes a full-tile multiply.
    w = (jnp.asarray(der_filter, jnp.float32) / jnp.float32(deno)).reshape(-1)
    k = int(w.shape[0])
    l_out = l - k + 1
    assert l_out >= 1

    # Lane width of each block: multiple of 128 -> (8,128)-aligned VMEM tiles
    # and lane-dense (unmasked except for the edge block) stores.
    l_pad = ((l + 127) // 128) * 128

    # Row tile: multiple of 8, targeting ~4 MiB blocks (amortizes the ~0.35 us
    # per-grid-step overhead; double-buffered in+out stays <= ~16 MiB, under
    # the explicit vmem limit below on every generation).
    target_block_bytes = 4 * 1024 * 1024
    row_bytes = l_pad * 4
    tn = max(8, (target_block_bytes // row_bytes) // 8 * 8)
    tn = min(tn, ((n + 7) // 8) * 8)            # never bigger than the row count
    if n >= 16:                                  # >= 2 grid steps: feeds both v7x TCs
        tn = min(tn, ((n + 1) // 2 + 7) // 8 * 8)
    tn = max(tn, 8)
    grid_rows = pl.cdiv(n, tn)

    x2d = x[:, 0, :]                             # (N, L): pure reshape, no pad/copy

    kernel = functools.partial(_conv1d_deriv_kernel, kernel_size=k)

    out2d = pl.pallas_call(
        kernel,
        out_shape=jax.ShapeDtypeStruct((n, l_out), jnp.float32),
        grid=(grid_rows,),
        in_specs=[
            pl.BlockSpec(memory_space=pltpu.SMEM),        # filter taps (scalars)
            pl.BlockSpec((tn, l_pad), lambda i: (i, 0)),  # row tile of input
        ],
        out_specs=pl.BlockSpec((tn, l_pad), lambda i: (i, 0)),
        compiler_params=pltpu.CompilerParams(
            dimension_semantics=("parallel",),
            vmem_limit_bytes=48 * 1024 * 1024,
        ),
        cost_estimate=pl.CostEstimate(
            flops=2 * k * n * l_out,
            transcendentals=0,
            bytes_accessed=4 * (n * l + n * l_out),   # true HBM traffic
        ),
    )(w, x2d)

    # Restore the channel dim.
    return out2d.reshape(n, 1, l_out)


def _reference(x, der_filter, deno):
    # Plain-JAX reference of the PyTorch conv1d (valid, stride 1, no bias).
    x = jnp.asarray(x, jnp.float32)
    w = jnp.asarray(der_filter, jnp.float32).reshape(-1)
    k = w.shape[0]
    n, _, l = x.shape
    l_out = l - k + 1
    cols = jnp.stack([x[:, 0, i:i + l_out] for i in range(k)], axis=-1)  # (N, L_out, K)
    return (cols @ w).reshape(n, 1, l_out) / float(deno)


if __name__ == "__main__":
    # Deterministic parameter init (as in the training script: a central
    # finite-difference filter and a denominator of 2*dt).
    der_filter = jnp.array([[[-1.0, 0.0, 1.0]]], dtype=jnp.float32)  # (1,1,3)
    deno = 2.0 * 0.1                                                  # 2*dt

    key = jax.random.PRNGKey(0)
    k1, k2 = jax.random.split(key)

    # Case 1: the module's typical small shape, (N, 1, L).
    x1 = jax.random.normal(k1, (2, 1, 16), dtype=jnp.float32)
    out1 = jax.block_until_ready(conv1d_derivative(x1, der_filter, deno))
    ref1 = _reference(x1, der_filter, deno)
    assert out1.shape == (2, 1, 14), out1.shape
    assert jnp.allclose(out1, ref1, atol=1e-5, rtol=1e-5), "mismatch vs reference (case 1)"

    # Case 2: exercises partial edge blocks on both axes (N % 8 != 0,
    # L % 128 != 0) to validate the OOB-masked load/store path that replaced
    # the explicit pad/slice.
    x2 = jax.random.normal(k2, (10, 1, 200), dtype=jnp.float32)
    out2 = jax.block_until_ready(conv1d_derivative(x2, der_filter, deno))
    ref2 = _reference(x2, der_filter, deno)
    assert out2.shape == (10, 1, 198), out2.shape
    assert jnp.allclose(out2, ref2, atol=1e-5, rtol=1e-5), "mismatch vs reference (case 2)"

    print("KERNEL_OK")
</pallas_src>

<mosaic_0001>
module attributes {stable_mosaic.version = 11 : i64} {
  func.func @_conv1d_deriv_kernel(%arg0: i32, %arg1: memref<3xf32, #tpu.memory_space<smem>>, %arg2: memref<8x128xf32, #tpu.memory_space<vmem>>, %arg3: memref<8x128xf32, #tpu.memory_space<vmem>>) attributes {dimension_semantics = [#tpu.dimension_semantics<parallel>], iteration_bounds = array<i64: 1>, scalar_prefetch = 0 : i64, scratch_operands = 0 : i64, tpu.core_type = #tpu.core_type<tc>, window_params = [{transform_indices = @transform_0, window_bounds = array<i64: 3>}, {transform_indices = @transform_1, window_bounds = array<i64: 8, 128>}, {transform_indices = @transform_2, window_bounds = array<i64: 8, 128>}]} {
    %c0 = arith.constant 0 : index
    %c0_0 = arith.constant 0 : index
    %0 = vector.load %arg2[%c0, %c0_0] : memref<8x128xf32, #tpu.memory_space<vmem>>, vector<8x128xf32>
    %c0_1 = arith.constant 0 : index
    %1 = memref.load %arg1[%c0_1] : memref<3xf32, #tpu.memory_space<smem>>
    %2 = vector.broadcast %1 : f32 to vector<8x128xf32>
    %3 = arith.mulf %2, %0 : vector<8x128xf32>
    %c1 = arith.constant 1 : index
    %4 = memref.load %arg1[%c1] : memref<3xf32, #tpu.memory_space<smem>>
    %c127_i32 = arith.constant 127 : i32
    %5 = tpu.dynamic_rotate %0 by %c127_i32 dim 1 : vector<8x128xf32>, i32 -> vector<8x128xf32>
    %6 = vector.broadcast %4 : f32 to vector<8x128xf32>
    %7 = arith.mulf %6, %5 : vector<8x128xf32>
    %8 = arith.addf %3, %7 : vector<8x128xf32>
    %c2 = arith.constant 2 : index
    %9 = memref.load %arg1[%c2] : memref<3xf32, #tpu.memory_space<smem>>
    %c126_i32 = arith.constant 126 : i32
    %10 = tpu.dynamic_rotate %0 by %c126_i32 dim 1 : vector<8x128xf32>, i32 -> vector<8x128xf32>
    %11 = vector.broadcast %9 : f32 to vector<8x128xf32>
    %12 = arith.mulf %11, %10 : vector<8x128xf32>
    %13 = arith.addf %8, %12 : vector<8x128xf32>
    %c0_2 = arith.constant 0 : index
    %c0_3 = arith.constant 0 : index
    %14 = vector.load %arg3[%c0_2, %c0_3] : memref<8x128xf32, #tpu.memory_space<vmem>>, vector<8x128xf32>
    tpu.vector_store %arg3[%c0_2, %c0_3], %13 {strides = array<i32>} : memref<8x128xf32, #tpu.memory_space<vmem>>, vector<8x128xf32>,
    return
  }
  func.func @transform_0(%arg0: i32) -> i32 {
    %c0_i32 = arith.constant 0 : i32
    %c0_i32_0 = arith.constant 0 : i32
    return %c0_i32 : i32
  }
  func.func @transform_1(%arg0: i32) -> (i32, i32) {
    %c0_i32 = arith.constant 0 : i32
    %c0_i32_0 = arith.constant 0 : i32
    return %arg0, %c0_i32 : i32, i32
  }
  func.func @transform_2(%arg0: i32) -> (i32, i32) {
    %c0_i32 = arith.constant 0 : i32
    %c0_i32_0 = arith.constant 0 : i32
    return %arg0, %c0_i32 : i32, i32
  }
}

</mosaic_0001>

<bundles_post_ra>
// kernel: tpu_custom_call.1
= control target key start
LH: loop header
LB: loop body
LE: loop exit
PB: predicated region body
PF: predicated region fallthrough
CT: control target
= control target key end

     0   :  { %7 = vsyncpa [#allocation5], 0  ;;  %s172_s0 = inlined_call_operand.hbm [shape: f32[3], index: 0, kind: input, shape index: {}]   ;;  %s173_s1 = inlined_call_operand.hbm [shape: f32[2,16], index: 1, kind: input, shape index: {}]   ;;  %s174_s2 = inlined_call_operand.hbm [shape: f32[2,14], index: 2, kind: output, shape index: {}]  }
   0x1   :  { %8 = vsyncpa [#allocation3], 0 }
   0x2   :  { %9 = vsyncpa [#allocation4], 0  ;;  %s135_s9 = smov [#allocation2]  }
   0x3   :  { %17 = dma.hbm_to_smem %s172_s0, 16, %s135_s9, [#allocation5]  }
   0x4   :  { %22 = vsyncadd [#allocation3], 96  ;;  %s136_s12 = smov [#allocation6]  }
   0x5   :  { %s23_s13 = sshll.u32 %s136_s12, 4  ;;  %s24_s13 = int_to_ptr.vmem [resolvable:$true] %s23_s13 }
   0x6   :  { %s97_s14 = scalar_lea.vmem %s24_s13, 32  ;;  %s101_s15 = scalar_lea.vmem %s24_s13, 128 }
   0x7   :  { %p98_p0 = scmp.ne.s32.totalorder %s24_s13, %s97_s14  ;;  %p102_p1 = scmp.lt.s32.totalorder %s24_s13, %s24_s13 }
   0x8   :  { %p103_p2 = scmp.lt.s32.totalorder %s101_s15, %s97_s14 }
   0xa   :  { %p104_p3 = por %p103_p2, %p102_p1 }
   0xc   :  { %p105_p4 = pnand %p104_p3, %p98_p0 }
   0xe   :  { %108 = shalt.err (!%p105_p4)
}
   0xf   :  { %s137_s16 = smov 32   ;;  %s138_s17 = smov 2  }
  0x10   :  { %29 = dma.hbm_to_vmem [thread:$0]  %s173_s1, 32, %s24_s13, [#allocation3], %s137_s16, %s137_s16, %s138_s17  }
  0x11   :  { %129 = dma.done.wait [#allocation5], 16  }
  0x12   :  { %130 = vsyncadd [#allocation5], 4294967280 }
  0x13   :  { %131 = dma.done.wait [#allocation3], 128  }
  0x14   :  { %132 = vsyncadd [#allocation3], 4294967168 }
  0x15   :  { %36 = sfence }
  0x16   :  { %v37_v0 = vld [vmem:[#allocation6] sm:$0xff]  ;;  %s139_s0 = smov 127   ;;  %s140_s20 = smov 126  }
  0x17   :  { %42 = vrot.lane.b32.xlu0 %v37_v0, %s139_s0  ;;  %s38_s21 = sld [smem:[#allocation2]] }
  0x18   :  { %s72_s22 = sld [smem:[#allocation2 + $0x1]] }
  0x19   :  { %s73_s23 = sld [smem:[#allocation2 + $0x2]] }
  0x1b   :  { %48 = vrot.lane.b32.xlu0 %v37_v0, %s140_s20 }
  0x1d   :  { %v39_v1 = vstv %s38_s21 }
  0x1e   :  { %v44_v2 = vstv %s72_s22  ;;  %v40_v4 = vmul.f32 %v39_v1, %v37_v0 }
  0x1f   :  { %v50_v6 = vstv %s73_s23 }
  0x89   :  { %v43_v3 = vpop.permute.xlu0 %42 }
  0x8a   :  { %v45_v5 = vmul.f32 %v44_v2, %v43_v3 }
  0x8c   :  { %v46_v8 = vadd.f32 %v45_v5, %v40_v4 }
  0x8d   :  { %v49_v7 = vpop.permute.xlu0 %48 }
  0x8e   :  { %v51_v9 = vmul.f32 %v50_v6, %v49_v7 }
  0x90   :  { %v52_v10 = vadd.f32 %v51_v9, %v46_v8 }
  0x92   :  { %53 = vst [vmem:[#allocation7] sm:$0xff] %v52_v10 }
  0x93   :  { %58 = vsyncadd [#allocation4], 96  ;;  %s141_s1 = smov [#allocation7]  }
  0x94   :  { %s59_s24 = sshll.u32 %s141_s1, 4  ;;  %s60_s24 = int_to_ptr.vmem [resolvable:$true] %s59_s24 }
  0x95   :  { %s109_s25 = scalar_lea.vmem %s60_s24, 32  ;;  %s113_s26 = scalar_lea.vmem %s60_s24, 128 }
  0x96   :  { %p110_p5 = scmp.ne.s32.totalorder %s60_s24, %s109_s25  ;;  %p114_p6 = scmp.lt.s32.totalorder %s60_s24, %s60_s24 }
  0x97   :  { %p115_p7 = scmp.lt.s32.totalorder %s113_s26, %s109_s25 }
  0x99   :  { %p116_p8 = por %p115_p7, %p114_p6 }
  0x9b   :  { %p117_p9 = pnand %p116_p8, %p110_p5 }
  0x9d   :  { %120 = shalt.err (!%p117_p9)
}
  0x9e   :  { %65 = dma.vmem_to_hbm [thread:$0]  %s60_s24, 32, %s174_s2, [#allocation4], %s137_s16, %s137_s16, %s138_s17  }
  0x9f   :  { %133 = dma.done.wait [#allocation4], 128  }
  0xa0   :  { %134 = vsyncadd [#allocation4], 4294967168 }
  0xa1   :  { %69 = vsyncpa [#allocation3], 1 }
  0xa2   :  { %70 = vsyncpa [#allocation4], 1 }
  0xa3   :  { %71 = vsyncpa [#allocation5], 1 }

</bundles_post_ra>
